<compile_context>
chip_gen: v7x
topology: tpu7x:2x2x1
jax: 0.10.0
libtpu: 0.0.40
codegen_flags: <defaults>
</compile_context>

<pallas_src>
import functools

import jax
import jax.numpy as jnp
from jax.experimental import pallas as pl
from jax.experimental.pallas import tpu as pltpu


# ------------------------------- helpers ----------------------------------- #

def _round_up(v, m):
    return ((v + m - 1) // m) * m


def _round_down(v, m):
    return max(m, (v // m) * m)


def _physical_vmem_bytes():
    try:
        return int(pltpu.get_tpu_info().vmem_capacity_bytes)
    except Exception:
        return 64 << 20  # conservative fallback: v7x per-TensorCore physical VMEM


# ----------------------------- Pallas kernel ------------------------------- #

def _layernorm_kernel(x_ref, gamma_ref, beta_ref, o_ref, *, eps):
    """LayerNorm over the last dim of one (tile, F) block."""
    x = x_ref[...].astype(jnp.float32)                   # (tile, F)
    mean = jnp.mean(x, axis=-1, keepdims=True)
    c = x - mean
    var = jnp.mean(c * c, axis=-1, keepdims=True)
    y = c * jax.lax.rsqrt(var + eps)                     # rsqrt -> EUP slot
    o_ref[...] = (y * gamma_ref[...] + beta_ref[...]).astype(o_ref.dtype)


# ------------------------------ call wrapper ------------------------------- #

def pallas_layernorm(x2d, gamma, beta, *, eps=1e-5, row_tile=8192):
    """LayerNorm over the last dim. x2d: (R, F); gamma/beta: (F,)."""
    R, F = x2d.shape
    out_dtype = x2d.dtype
    itemsize = jnp.dtype(x2d.dtype).itemsize
    sublane = max(8, 32 // itemsize)      # 8 for f32, 16 for bf16, 32 for int8

    # --- tile selection against a per-generation VMEM budget --------------- #
    phys_vmem = _physical_vmem_bytes()
    budget = min(32 << 20, phys_vmem // 2 - (4 << 20))   # streaming buffers only
    bytes_per_row = 2 * 2 * F * itemsize                 # in+out, double-buffered
    max_rows = max(sublane, budget // max(bytes_per_row, 1))
    tile = min(row_tile, max_rows)
    # Keep at least 2 grid steps so both v7x TensorCores get work
    # (harmless extra ~0.35us step on single-TC v5e/v6e).
    if R > 2 * sublane:
        tile = min(tile, _round_up(pl.cdiv(R, 2), sublane))
    tile = _round_down(tile, sublane)
    tile = min(tile, _round_up(R, sublane))
    if tile >= R:
        tile = R                          # single full-extent block, always legal
    grid = pl.cdiv(R, tile)

    # Explicit scoped-VMEM limit: covers the chosen tile on v5e's 16 MiB default
    # and stays well under v7x's 64 MiB physical VMEM.
    vmem_need = 2 * tile * F * 2 * itemsize + 4 * F * 4
    vmem_limit = int(min(phys_vmem - (16 << 20),
                         max(vmem_need + (8 << 20), 32 << 20)))

    gamma2d = gamma.astype(jnp.float32).reshape(1, F)
    beta2d = beta.astype(jnp.float32).reshape(1, F)

    cost = pl.CostEstimate(
        flops=int(7 * R * F),             # sub/mul/sum x2 + scale/shift (VPU/XLU)
        transcendentals=int(R),           # one rsqrt per row
        bytes_accessed=int(2 * R * F * itemsize + 2 * F * 4),
    )

    kernel = functools.partial(_layernorm_kernel, eps=eps)
    out = pl.pallas_call(
        kernel,
        out_shape=jax.ShapeDtypeStruct((R, F), out_dtype),
        grid_spec=pltpu.PrefetchScalarGridSpec(
            num_scalar_prefetch=0,
            grid=(grid,),
            in_specs=[
                pl.BlockSpec((tile, F), lambda i: (i, 0)),
                pl.BlockSpec((1, F), lambda i: (0, 0)),
                pl.BlockSpec((1, F), lambda i: (0, 0)),
            ],
            out_specs=pl.BlockSpec((tile, F), lambda i: (i, 0)),
        ),
        compiler_params=pltpu.CompilerParams(
            dimension_semantics=("parallel",),
            vmem_limit_bytes=vmem_limit,
        ),
        cost_estimate=cost,
    )(x2d, gamma2d, beta2d)
    return out


# ------------------------------- Encoder glue ------------------------------ #

class EncoderPallas:
    """Mirrors Encoder(layer, N): N cloned layers followed by LayerNorm(size)."""

    def __init__(self, size, num_layers, key):
        self.size = size
        self.num_layers = num_layers
        kg, kb = jax.random.split(key)
        # nn.LayerNorm defaults are weight=1, bias=0; small deterministic
        # perturbation so the affine transform is exercised non-trivially.
        self.gamma = 1.0 + 0.01 * jax.random.normal(kg, (size,), jnp.float32)
        self.beta = 0.01 * jax.random.normal(kb, (size,), jnp.float32)

    def __call__(self, x, src_trend=None):
        # x: (batch, N_nodes, T_in, F_in)
        for _ in range(self.num_layers):
            # TODO(synk): EncoderLayer is not defined in the provided source;
            # the per-layer transform is left as identity rather than faked.
            x = x
        B, N, T, F = x.shape
        x2d = x.reshape(B * N * T, F)
        y2d = pallas_layernorm(x2d, self.gamma, self.beta)
        return y2d.reshape(B, N, T, F)


# ----------------------------------- main ---------------------------------- #

if __name__ == "__main__":
    key = jax.random.PRNGKey(0)
    kx, kp = jax.random.split(key)

    batch, n_nodes, t_in, f_in = 2, 4, 8, 32     # (batch_size, N, T_in, F_in)
    x = jax.random.normal(kx, (batch, n_nodes, t_in, f_in), jnp.float32)

    encoder = EncoderPallas(size=f_in, num_layers=2, key=kp)

    out = jax.block_until_ready(encoder(x))

    # Reference check against plain-JAX LayerNorm.
    mean = jnp.mean(x, axis=-1, keepdims=True)
    var = jnp.mean((x - mean) ** 2, axis=-1, keepdims=True)
    ref = (x - mean) * jax.lax.rsqrt(var + 1e-5) * encoder.gamma + encoder.beta

    assert out.shape == (batch, n_nodes, t_in, f_in)
    err = float(jnp.max(jnp.abs(out - ref)))
    assert err < 5e-4, f"max abs err {err}"

    print("KERNEL_OK")
</pallas_src>

<mosaic_0001>
module attributes {stable_mosaic.version = 11 : i64} {
  func.func @_layernorm_kernel(%arg0: i32, %arg1: memref<32x32xf32, #tpu.memory_space<vmem>>, %arg2: memref<1x32xf32, #tpu.memory_space<vmem>>, %arg3: memref<1x32xf32, #tpu.memory_space<vmem>>, %arg4: memref<32x32xf32, #tpu.memory_space<vmem>>) attributes {dimension_semantics = [#tpu.dimension_semantics<parallel>], iteration_bounds = array<i64: 2>, scalar_prefetch = 0 : i64, scratch_operands = 0 : i64, tpu.core_type = #tpu.core_type<tc>, window_params = [{transform_indices = @transform_0, window_bounds = array<i64: 32, 32>}, {pipeline_mode = #tpu.pipeline_mode<synchronous>, transform_indices = @transform_1, window_bounds = array<i64: 1, 32>}, {pipeline_mode = #tpu.pipeline_mode<synchronous>, transform_indices = @transform_2, window_bounds = array<i64: 1, 32>}, {transform_indices = @transform_3, window_bounds = array<i64: 32, 32>}]} {
    %c0 = arith.constant 0 : index
    %c0_0 = arith.constant 0 : index
    %0 = vector.load %arg1[%c0, %c0_0] : memref<32x32xf32, #tpu.memory_space<vmem>>, vector<32x32xf32>
    %cst = arith.constant dense<0.000000e+00> : vector<32xf32>
    %1 = vector.multi_reduction <add>, %0, %cst [1] : vector<32x32xf32> to vector<32xf32>
    %2 = vector.shape_cast %1 : vector<32xf32> to vector<32x1xf32>
    %cst_1 = arith.constant 3.200000e+01 : f32
    %3 = vector.broadcast %cst_1 : f32 to vector<32x1xf32>
    %4 = arith.divf %2, %3 : vector<32x1xf32>
    %5 = vector.broadcast %4 : vector<32x1xf32> to vector<32x32xf32>
    %6 = arith.subf %0, %5 : vector<32x32xf32>
    %7 = arith.mulf %6, %6 : vector<32x32xf32>
    %cst_2 = arith.constant dense<0.000000e+00> : vector<32xf32>
    %8 = vector.multi_reduction <add>, %7, %cst_2 [1] : vector<32x32xf32> to vector<32xf32>
    %9 = vector.shape_cast %8 : vector<32xf32> to vector<32x1xf32>
    %cst_3 = arith.constant 3.200000e+01 : f32
    %10 = vector.broadcast %cst_3 : f32 to vector<32x1xf32>
    %11 = arith.divf %9, %10 : vector<32x1xf32>
    %cst_4 = arith.constant 9.99999974E-6 : f32
    %12 = vector.broadcast %cst_4 : f32 to vector<32x1xf32>
    %13 = arith.addf %11, %12 : vector<32x1xf32>
    %14 = math.rsqrt %13 : vector<32x1xf32>
    %15 = vector.broadcast %14 : vector<32x1xf32> to vector<32x32xf32>
    %16 = arith.mulf %6, %15 : vector<32x32xf32>
    %c0_5 = arith.constant 0 : index
    %c0_6 = arith.constant 0 : index
    %17 = vector.load %arg2[%c0_5, %c0_6] : memref<1x32xf32, #tpu.memory_space<vmem>>, vector<1x32xf32>
    %18 = vector.broadcast %17 : vector<1x32xf32> to vector<32x32xf32>
    %19 = arith.mulf %16, %18 : vector<32x32xf32>
    %c0_7 = arith.constant 0 : index
    %c0_8 = arith.constant 0 : index
    %20 = vector.load %arg3[%c0_7, %c0_8] : memref<1x32xf32, #tpu.memory_space<vmem>>, vector<1x32xf32>
    %21 = vector.broadcast %20 : vector<1x32xf32> to vector<32x32xf32>
    %22 = arith.addf %19, %21 : vector<32x32xf32>
    %c0_9 = arith.constant 0 : index
    %c0_10 = arith.constant 0 : index
    %23 = vector.load %arg4[%c0_9, %c0_10] : memref<32x32xf32, #tpu.memory_space<vmem>>, vector<32x32xf32>
    tpu.vector_store %arg4[%c0_9, %c0_10], %22 {strides = array<i32>} : memref<32x32xf32, #tpu.memory_space<vmem>>, vector<32x32xf32>,
    return
  }
  func.func @transform_0(%arg0: i32) -> (i32, i32) {
    %c0_i32 = arith.constant 0 : i32
    %c0_i32_0 = arith.constant 0 : i32
    return %arg0, %c0_i32 : i32, i32
  }
  func.func @transform_1(%arg0: i32) -> (i32, i32) {
    %c0_i32 = arith.constant 0 : i32
    %c0_i32_0 = arith.constant 0 : i32
    %c0_i32_1 = arith.constant 0 : i32
    return %c0_i32, %c0_i32_0 : i32, i32
  }
  func.func @transform_2(%arg0: i32) -> (i32, i32) {
    %c0_i32 = arith.constant 0 : i32
    %c0_i32_0 = arith.constant 0 : i32
    %c0_i32_1 = arith.constant 0 : i32
    return %c0_i32, %c0_i32_0 : i32, i32
  }
  func.func @transform_3(%arg0: i32) -> (i32, i32) {
    %c0_i32 = arith.constant 0 : i32
    %c0_i32_0 = arith.constant 0 : i32
    return %arg0, %c0_i32 : i32, i32
  }
}

</mosaic_0001>

<bundles_post_ra>
// kernel: tpu_custom_call.1
= control target key start
LH: loop header
LB: loop body
LE: loop exit
PB: predicated region body
PF: predicated region fallthrough
CT: control target
= control target key end

     0   :  { %s371_s12 = smov 0   ;;  %s413_s0 = inlined_call_operand.vmem [shape: f32[64,32], index: 0, kind: input, shape index: {}]   ;;  %s414_s1 = inlined_call_operand.vmem [shape: f32[1,32], index: 1, kind: input, shape index: {}]   ;;  %s415_s2 = inlined_call_operand.vmem [shape: f32[1,32], index: 2, kind: input, shape index: {}]   ;;  %s416_s3 = inlined_call_operand.vmem [shape: f32[64,32], index: 3, kind: output, shape index: {}]  }
   0x1 LB: > { %s314_s13 = sadd.s32 4294967295, %s349_s12   ;;  %p318_p0 = scmp.ge.s32.totalorder %s349_s12, 1  ;;  %s349_s12 = sphi %s371_s12, %s13_s12  }
   0x2   : > { %p138_p1 = scmp.lt.s32.totalorder %s349_s12, 3 }
   0x4   : > { %p139_p2 = pnand %p318_p0, %p138_p1 }
   0x5   : > { %s319_s14 = sshll.u32 (!%p139_p2), %s314_s13, 2  ;;  %vm178_vm0 = vcmask (!%p139_p2), 261120   ;;  %v323_v41 = vld [vmem:[%s414_s1] ss:$0 sm:$0xff] (!%p139_p2) }
   0x6   : > { %142 = sbr.rel (%p139_p2) target bundleno = 339 (0x153), region = 32  ;;  %p163_p3 = scmp.lt.s32.totalorder (!%p139_p2), %s319_s14, 7  ;;  %v324_v43 = vld [vmem:[%s415_s2] ss:$0 sm:$0xff] (!%p139_p2) }
   0xd   : > { %s418_s14 = smov (!%p163_p3, %s319_s14), 7 }
   0xe   : > { %s320_s15 = sshll.u32 %s418_s14, 3 }
   0xf   : > { %s166_s18 = scalar_lea.vmem %s413_s0, %s320_s15  ;;  %s172_s25 = scalar_lea.vmem %s416_s3, %s320_s15 }
  0x10   : > { %v174_v0 = vld [vmem:[%s166_s18] sm:$0xff]  ;;  %v176_v1 = vld [vmem:[%s166_s18 + $0x10] sm:$0xff]  ;;  %v175_v2 = vld [vmem:[%s166_s18 + $0x8] sm:$0xff] }
  0x11   : > { %v179_v3 = vsel %vm178_vm0, %v174_v0, 0.0  ;;  %v185_v4 = vsel %vm178_vm0, %v176_v1, 0.0  ;;  %v177_v5 = vld [vmem:[%s166_s18 + $0x18] sm:$0xff]  ;;  %v182_v6 = vsel %vm178_vm0, %v175_v2, 0.0 }
  0x12   : > { %180 = vadd.xlane.f32.xlu0 %v179_v3  ;;  %186 = vadd.xlane.f32.xlu1 %v185_v4  ;;  %v188_v7 = vsel %vm178_vm0, %v177_v5, 0.0 }
  0x16   : > { %183 = vadd.xlane.f32.xlu0 %v182_v6  ;;  %189 = vadd.xlane.f32.xlu1 %v188_v7 }
  0x9f   : > { %v181_v8 = vpop.xlane.xlu0 %180  ;;  %v187_v9 = vpop.xlane.xlu1 %186 }
  0xa0   : > { %v192_v10 = vmul.f32 0.03125, %v181_v8  ;;  %v194_v11 = vmul.f32 0.03125, %v187_v9 }
  0xa2   : > { %v196_v12 = vsub.f32 %v174_v0, %v192_v10  ;;  %v198_v13 = vsub.f32 %v176_v1, %v194_v11 }
  0xa3   : > { %v184_v14 = vpop.xlane.xlu0 %183  ;;  %v190_v15 = vpop.xlane.xlu1 %189 }
  0xa4   : > { %v193_v16 = vmul.f32 0.03125, %v184_v14  ;;  %v195_v17 = vmul.f32 0.03125, %v190_v15  ;;  %v200_v18 = vmul.f32 %v196_v12, %v196_v12  ;;  %v202_v19 = vmul.f32 %v198_v13, %v198_v13 }
  0xa6   : > { %v197_v20 = vsub.f32 %v175_v2, %v193_v16  ;;  %v199_v21 = vsub.f32 %v177_v5, %v195_v17  ;;  %v204_v22 = vsel %vm178_vm0, %v200_v18, 0.0  ;;  %v210_v23 = vsel %vm178_vm0, %v202_v19, 0.0 }
  0xa7   : > { %205 = vadd.xlane.f32.xlu0 %v204_v22 }
  0xa8   : > { %v201_v24 = vmul.f32 %v197_v20, %v197_v20  ;;  %v203_v25 = vmul.f32 %v199_v21, %v199_v21 }
  0xaa   : > { %v207_v26 = vsel %vm178_vm0, %v201_v24, 0.0  ;;  %v213_v27 = vsel %vm178_vm0, %v203_v25, 0.0 }
  0xab   : > { %211 = vadd.xlane.f32.xlu0 %v210_v23  ;;  %208 = vadd.xlane.f32.xlu1 %v207_v26 }
  0xaf   : > { %214 = vadd.xlane.f32.xlu1 %v213_v27 }
 0x134   : > { %v206_v28 = vpop.xlane.xlu0 %205 }
 0x135   : > { %v216_v29 = vmul.f32 0.03125, %v206_v28 }
 0x137   : > { %v220_v30 = vadd.f32 1e-05, %v216_v29 }
 0x138   : > { %v209_v31 = vpop.xlane.xlu1 %208  ;;  %v212_v32 = vpop.xlane.xlu0 %211 }
 0x139   : > { %335 = vrsqrt.f32 %v220_v30  ;;  %v217_v33 = vmul.f32 0.03125, %v209_v31  ;;  %v218_v34 = vmul.f32 0.03125, %v212_v32 }
 0x13b   : > { %v221_v35 = vadd.f32 1e-05, %v217_v33  ;;  %v222_v36 = vadd.f32 1e-05, %v218_v34 }
 0x13c   : > { %v215_v37 = vpop.xlane.xlu1 %214 }
 0x13d   : > { %337 = vrsqrt.f32 %v221_v35  ;;  %v219_v38 = vmul.f32 0.03125, %v215_v37 }
 0x13e   : > { %339 = vrsqrt.f32 %v222_v36 }
 0x13f   : > { %v223_v39 = vadd.f32 1e-05, %v219_v38 }
 0x141   : > { %341 = vrsqrt.f32 %v223_v39 }
 0x143   : > { %v336_v40 = vpop.eup %335 }
 0x144   : > { %v228_v42 = vmul.f32 %v336_v40, %v196_v12 }
 0x146   : > { %v239_v44 = vmul.f32 %v323_v41, %v228_v42 }
 0x147   : > { %v338_v45 = vpop.eup %337 }
 0x148   : > { %v340_v46 = vpop.eup %339  ;;  %v250_v47 = vadd.f32 %v324_v43, %v239_v44  ;;  %v229_v48 = vmul.f32 %v338_v45, %v197_v20 }
 0x149   : > { %v230_v49 = vmul.f32 %v340_v46, %v198_v13 }
 0x14a   : > { %254 = vst.msk [vmem:[%s172_s25] sm:$0xff] %vm178_vm0, %v250_v47  ;;  %v240_v50 = vmul.f32 %v323_v41, %v229_v48 }
 0x14b   : > { %v342_v51 = vpop.eup %341  ;;  %v241_v52 = vmul.f32 %v323_v41, %v230_v49 }
 0x14c   : > { %v251_v53 = vadd.f32 %v324_v43, %v240_v50  ;;  %v231_v54 = vmul.f32 %v342_v51, %v199_v21 }
 0x14d   : > { %v252_v55 = vadd.f32 %v324_v43, %v241_v52 }
 0x14e   : > { %255 = vst.msk [vmem:[%s172_s25 + $0x8] sm:$0xff] %vm178_vm0, %v251_v53  ;;  %v242_v56 = vmul.f32 %v323_v41, %v231_v54 }
 0x14f   : > { %256 = vst.msk [vmem:[%s172_s25 + $0x10] sm:$0xff] %vm178_vm0, %v252_v55 }
 0x150   : > { %v253_v57 = vadd.f32 %v324_v43, %v242_v56 }
 0x152   : > { %257 = vst.msk [vmem:[%s172_s25 + $0x18] sm:$0xff] %vm178_vm0, %v253_v57 }
 0x153 PF: > { %s13_s12 = sadd.s32 1, %s349_s12  }
 0x154   : > { %p10_p4 = scmp.ge.s32.totalorder %s13_s12, 4  }
 0x156   :  { %12 = sbr.rel (!%p10_p4) target bundleno = 1 (0x1), region = 62 }

</bundles_post_ra>
